<compile_context>
chip_gen: v7x
topology: tpu7x:2x2x1
jax: 0.10.0
libtpu: 0.0.40
codegen_flags: <defaults>
</compile_context>

<pallas_src>
import functools

import jax
import jax.numpy as jnp
from jax.experimental import pallas as pl
from jax.experimental.pallas import tpu as pltpu


def _round_up(x: int, m: int) -> int:
    return ((x + m - 1) // m) * m


def _cdiv(a: int, b: int) -> int:
    return -(-a // b)


def _vmem_capacity_bytes() -> int:
    """Physical VMEM per TensorCore (128 MiB v5e/v6e, 64 MiB v7x)."""
    try:
        return int(pltpu.get_tpu_info().vmem_capacity_bytes)
    except Exception:
        return 64 << 20  # conservative fallback (v7x per-TC)


def _autoencoder_kernel(x_ref, w1_ref, b1_ref, w2_ref, b2_ref, o_ref):
    """Fused encode->decode for one batch tile: (TB,D) -> (TB,HID) -> (TB,D)."""
    x = x_ref[...]                                                   # (TB, D) f32
    # ---- encode: Linear(D -> HID) + ReLU (f32 MXU accumulation) ----
    w1 = w1_ref[...].astype(jnp.float32)
    h = jnp.dot(x, w1, preferred_element_type=jnp.float32)           # (TB, HID)
    h = jnp.maximum(h + b1_ref[...], 0.0)
    # ---- decode: Linear(HID -> D) + Sigmoid ----
    w2 = w2_ref[...].astype(jnp.float32)
    y = jnp.dot(h, w2, preferred_element_type=jnp.float32) + b2_ref[...]
    # sigmoid(y) = 1 / (1 + exp(-y)): exp and reciprocal both run on the EUP
    # slot, keeping the divide off the (busier) VPU in the epilogue.
    z = jnp.exp(-y)
    o_ref[...] = pl.reciprocal(1.0 + z, approx=True).astype(o_ref.dtype)


@functools.partial(jax.jit, static_argnames=("max_tile", "weights_dtype"))
def autoencoder_frame_forward(x_nchw, w1, b1, w2, b2, *, max_tile=512,
                              weights_dtype=jnp.bfloat16):
    """Forward pass of AutoEncoderFrame (== encoder(x)) as a Pallas TPU kernel.

    x_nchw : (N, C, H, W) float32
    w1     : (D, HID),  b1: (1, HID)
    w2     : (HID, D),  b2: (1, D)
    returns: (N, C, H, W) float32 reconstruction
    """
    N, C, H, W = x_nchw.shape
    D = C * H * W
    HID = w1.shape[1]

    # --- lane-dense padded shapes ---
    D_pad = _round_up(D, 128)
    HID_pad = _round_up(max(HID, 128), 128)
    wbytes = jnp.dtype(weights_dtype).itemsize

    # --- generation-aware VMEM budget ---
    # Weights/biases are single-buffered (pl.Buffered(1), constant index_map);
    # x/out tiles are double-buffered; the h intermediate also lives in VMEM.
    cap = (3 * _vmem_capacity_bytes()) // 4
    weight_bytes = 2 * D_pad * HID_pad * wbytes + (HID_pad + D_pad) * 4
    act_row_bytes = 2 * 2 * D_pad * 4        # x + out tile rows, double-buffered f32
    h_row_bytes = HID_pad * 4                # encode intermediate
    if weight_bytes + 8 * (act_row_bytes + h_row_bytes) + (2 << 20) > cap:
        # TODO(synk): tile W2/b2/out over D columns (and K-tile the encode with an
        # f32 accumulator) when resident weights exceed the per-core VMEM budget
        # (v7x: 64 MiB/TC); not needed at these shapes.
        raise ValueError(
            f"Resident weights ({weight_bytes} B) exceed the VMEM budget ({cap} B).")
    rows_budget = (cap - weight_bytes - (2 << 20)) // (act_row_bytes + h_row_bytes)

    # --- balanced batch tile: multiple of 8 sublanes, minimal padding ---
    tb_cap = max(8, (min(max_tile, int(rows_budget)) // 8) * 8)
    TB = _round_up(_cdiv(N, _cdiv(N, tb_cap)), 8)
    if _cdiv(N, TB) == 1 and TB >= 16:
        TB = _round_up(_cdiv(N, 2), 8)       # >=2 grid steps so both v7x TCs get work
    grid_steps = _cdiv(N, TB)
    N_pad = grid_steps * TB

    # --- zero-pad only when needed (padding is numerically inert:
    #     ReLU(0)=0, zero W2 rows/b1 entries; padded rows are discarded) ---
    xf = x_nchw.reshape(N, D).astype(jnp.float32)
    x_p = xf if (N_pad == N and D_pad == D) else jnp.pad(
        xf, ((0, N_pad - N), (0, D_pad - D)))
    w1_p = w1.astype(weights_dtype)
    w2_p = w2.astype(weights_dtype)
    b1_p = b1.astype(jnp.float32)
    b2_p = b2.astype(jnp.float32)
    if D_pad != D or HID_pad != HID:
        w1_p = jnp.pad(w1_p, ((0, D_pad - D), (0, HID_pad - HID)))
        b1_p = jnp.pad(b1_p, ((0, 0), (0, HID_pad - HID)))
        w2_p = jnp.pad(w2_p, ((0, HID_pad - HID), (0, D_pad - D)))
        b2_p = jnp.pad(b2_p, ((0, 0), (0, D_pad - D)))

    vmem_limit = min(cap, max(32 << 20,
                              weight_bytes + TB * (act_row_bytes + h_row_bytes)
                              + (4 << 20)))

    cost = pl.CostEstimate(
        flops=4 * N_pad * D_pad * HID_pad,                 # two matmuls
        transcendentals=2 * N_pad * D_pad,                 # exp + reciprocal
        bytes_accessed=weight_bytes + 2 * N_pad * D_pad * 4,
    )

    out_flat = pl.pallas_call(
        _autoencoder_kernel,
        out_shape=jax.ShapeDtypeStruct((N_pad, D_pad), jnp.float32),
        grid=(grid_steps,),
        in_specs=[
            pl.BlockSpec((TB, D_pad), lambda i: (i, 0)),               # x tile (pipelined)
            pl.BlockSpec((D_pad, HID_pad), lambda i: (0, 0),
                         pipeline_mode=pl.Buffered(1)),                # W1 resident, 1 buffer
            pl.BlockSpec((1, HID_pad), lambda i: (0, 0),
                         pipeline_mode=pl.Buffered(1)),                # b1
            pl.BlockSpec((HID_pad, D_pad), lambda i: (0, 0),
                         pipeline_mode=pl.Buffered(1)),                # W2 resident, 1 buffer
            pl.BlockSpec((1, D_pad), lambda i: (0, 0),
                         pipeline_mode=pl.Buffered(1)),                # b2
        ],
        out_specs=pl.BlockSpec((TB, D_pad), lambda i: (i, 0)),
        compiler_params=pltpu.CompilerParams(
            dimension_semantics=("parallel",),             # shard batch tiles across TCs
            vmem_limit_bytes=int(vmem_limit),
        ),
        cost_estimate=cost,
    )(x_p, w1_p, b1_p, w2_p, b2_p)

    out = out_flat if (N_pad == N and D_pad == D) else out_flat[:N, :D]
    return out.reshape(N, C, H, W)


def _reference_forward(x_nchw, w1, b1, w2, b2):
    N = x_nchw.shape[0]
    xf = x_nchw.reshape(N, -1)
    h = jnp.maximum(xf @ w1 + b1, 0.0)
    y = jax.nn.sigmoid(h @ w2 + b2)
    return y.reshape(x_nchw.shape)


# TODO(synk): AutoEncoderFrame's logging / plotting / checkpoint-saving machinery
# (save_history, plot, save_plots, fit, generate, ...) is host-side filesystem
# bookkeeping with no tensor compute; not translatable to Pallas.

if __name__ == "__main__":
    # Small shapes consistent with the frame's image-autoencoder usage.
    N, C, H, W = 2, 4, 16, 16          # NCHW input
    D = C * H * W                      # 1024 flattened features
    HID = 32                           # latent dim

    key = jax.random.PRNGKey(0)
    kx, k1, k2, k3, k4 = jax.random.split(key, 5)

    x = jax.random.normal(kx, (N, C, H, W), dtype=jnp.float32)
    # Deterministic synthetic parameters (no checkpoint loading).
    w1 = 0.02 * jax.random.normal(k1, (D, HID), dtype=jnp.float32)
    b1 = 0.01 * jax.random.normal(k2, (1, HID), dtype=jnp.float32)
    w2 = 0.02 * jax.random.normal(k3, (HID, D), dtype=jnp.float32)
    b2 = 0.01 * jax.random.normal(k4, (1, D), dtype=jnp.float32)

    ref = _reference_forward(x, w1, b1, w2, b2)

    # f32-weight path: exact MXU accumulation, only the approx-EUP sigmoid differs.
    out_f32 = autoencoder_frame_forward(x, w1, b1, w2, b2, weights_dtype=jnp.float32)
    out_f32 = jax.block_until_ready(out_f32)
    assert out_f32.shape == x.shape and out_f32.dtype == jnp.float32
    assert jnp.allclose(out_f32, ref, atol=2e-3, rtol=2e-3)

    # bf16-weight path (default): halves weight HBM traffic / VMEM residency.
    out_bf16 = autoencoder_frame_forward(x, w1, b1, w2, b2)
    out_bf16 = jax.block_until_ready(out_bf16)
    assert out_bf16.shape == x.shape and out_bf16.dtype == jnp.float32
    assert jnp.allclose(out_bf16, ref, atol=1e-2, rtol=1e-2)

    print("KERNEL_OK")
</pallas_src>

<mosaic_0001>
module attributes {stable_mosaic.version = 11 : i64} {
  func.func @_autoencoder_kernel(%arg0: i32, %arg1: memref<8x1024xf32, #tpu.memory_space<vmem>>, %arg2: memref<1024x128xf32, #tpu.memory_space<vmem>>, %arg3: memref<1x128xf32, #tpu.memory_space<vmem>>, %arg4: memref<128x1024xf32, #tpu.memory_space<vmem>>, %arg5: memref<1x1024xf32, #tpu.memory_space<vmem>>, %arg6: memref<8x1024xf32, #tpu.memory_space<vmem>>) attributes {dimension_semantics = [#tpu.dimension_semantics<parallel>], iteration_bounds = array<i64: 1>, scalar_prefetch = 0 : i64, scratch_operands = 0 : i64, tpu.core_type = #tpu.core_type<tc>, window_params = [{transform_indices = @transform_0, window_bounds = array<i64: 8, 1024>}, {pipeline_mode = #tpu.pipeline_mode<synchronous>, transform_indices = @transform_1, window_bounds = array<i64: 1024, 128>}, {pipeline_mode = #tpu.pipeline_mode<synchronous>, transform_indices = @transform_2, window_bounds = array<i64: 1, 128>}, {pipeline_mode = #tpu.pipeline_mode<synchronous>, transform_indices = @transform_3, window_bounds = array<i64: 128, 1024>}, {pipeline_mode = #tpu.pipeline_mode<synchronous>, transform_indices = @transform_4, window_bounds = array<i64: 1, 1024>}, {transform_indices = @transform_5, window_bounds = array<i64: 8, 1024>}]} {
    %c0 = arith.constant 0 : index
    %c0_0 = arith.constant 0 : index
    %0 = vector.load %arg1[%c0, %c0_0] : memref<8x1024xf32, #tpu.memory_space<vmem>>, vector<8x1024xf32>
    %c0_1 = arith.constant 0 : index
    %c0_2 = arith.constant 0 : index
    %1 = vector.load %arg2[%c0_1, %c0_2] : memref<1024x128xf32, #tpu.memory_space<vmem>>, vector<1024x128xf32>
    %cst = arith.constant dense<0.000000e+00> : vector<8x128xf32>
    %2 = tpu.matmul %0, %1, %cst {dimension_numbers = #tpu.dot_dimension_numbers<[1], [0], [0], [1], [0, 0, 1, 1], [], []>} : vector<8x1024xf32>, vector<1024x128xf32>, vector<8x128xf32> -> vector<8x128xf32>
    %c0_3 = arith.constant 0 : index
    %c0_4 = arith.constant 0 : index
    %3 = vector.load %arg3[%c0_3, %c0_4] : memref<1x128xf32, #tpu.memory_space<vmem>>, vector<1x128xf32>
    %4 = vector.broadcast %3 : vector<1x128xf32> to vector<8x128xf32>
    %5 = arith.addf %2, %4 : vector<8x128xf32>
    %cst_5 = arith.constant 0.000000e+00 : f32
    %6 = vector.broadcast %cst_5 : f32 to vector<8x128xf32>
    %7 = arith.maximumf %5, %6 : vector<8x128xf32>
    %c0_6 = arith.constant 0 : index
    %c0_7 = arith.constant 0 : index
    %8 = vector.load %arg4[%c0_6, %c0_7] : memref<128x1024xf32, #tpu.memory_space<vmem>>, vector<128x1024xf32>
    %cst_8 = arith.constant dense<0.000000e+00> : vector<8x1024xf32>
    %9 = tpu.matmul %7, %8, %cst_8 {dimension_numbers = #tpu.dot_dimension_numbers<[1], [0], [0], [1], [0, 0, 1, 1], [], []>} : vector<8x128xf32>, vector<128x1024xf32>, vector<8x1024xf32> -> vector<8x1024xf32>
    %c0_9 = arith.constant 0 : index
    %c0_10 = arith.constant 0 : index
    %10 = vector.load %arg5[%c0_9, %c0_10] : memref<1x1024xf32, #tpu.memory_space<vmem>>, vector<1x1024xf32>
    %11 = vector.broadcast %10 : vector<1x1024xf32> to vector<8x1024xf32>
    %12 = arith.addf %9, %11 : vector<8x1024xf32>
    %cst_11 = arith.constant 0.000000e+00 : f32
    %13 = vector.broadcast %cst_11 : f32 to vector<8x1024xf32>
    %14 = arith.subf %13, %12 : vector<8x1024xf32>
    %15 = math.exp %14 : vector<8x1024xf32>
    %cst_12 = arith.constant 1.000000e+00 : f32
    %16 = vector.broadcast %cst_12 : f32 to vector<8x1024xf32>
    %17 = arith.addf %16, %15 : vector<8x1024xf32>
    %18 = tpu.reciprocal %17 {approx = true} : vector<8x1024xf32> -> vector<8x1024xf32>
    %c0_13 = arith.constant 0 : index
    %c0_14 = arith.constant 0 : index
    %19 = vector.load %arg6[%c0_13, %c0_14] : memref<8x1024xf32, #tpu.memory_space<vmem>>, vector<8x1024xf32>
    tpu.vector_store %arg6[%c0_13, %c0_14], %18 {strides = array<i32>} : memref<8x1024xf32, #tpu.memory_space<vmem>>, vector<8x1024xf32>,
    return
  }
  func.func @transform_0(%arg0: i32) -> (i32, i32) {
    %c0_i32 = arith.constant 0 : i32
    %c0_i32_0 = arith.constant 0 : i32
    return %arg0, %c0_i32 : i32, i32
  }
  func.func @transform_1(%arg0: i32) -> (i32, i32) {
    %c0_i32 = arith.constant 0 : i32
    %c0_i32_0 = arith.constant 0 : i32
    %c0_i32_1 = arith.constant 0 : i32
    return %c0_i32, %c0_i32_0 : i32, i32
  }
  func.func @transform_2(%arg0: i32) -> (i32, i32) {
    %c0_i32 = arith.constant 0 : i32
    %c0_i32_0 = arith.constant 0 : i32
    %c0_i32_1 = arith.constant 0 : i32
    return %c0_i32, %c0_i32_0 : i32, i32
  }
  func.func @transform_3(%arg0: i32) -> (i32, i32) {
    %c0_i32 = arith.constant 0 : i32
    %c0_i32_0 = arith.constant 0 : i32
    %c0_i32_1 = arith.constant 0 : i32
    return %c0_i32, %c0_i32_0 : i32, i32
  }
  func.func @transform_4(%arg0: i32) -> (i32, i32) {
    %c0_i32 = arith.constant 0 : i32
    %c0_i32_0 = arith.constant 0 : i32
    %c0_i32_1 = arith.constant 0 : i32
    return %c0_i32, %c0_i32_0 : i32, i32
  }
  func.func @transform_5(%arg0: i32) -> (i32, i32) {
    %c0_i32 = arith.constant 0 : i32
    %c0_i32_0 = arith.constant 0 : i32
    return %arg0, %c0_i32 : i32, i32
  }
}

</mosaic_0001>

<bundles_post_ra>
// kernel: autoencoder_frame_forward.1
= control target key start
LH: loop header
LB: loop body
LE: loop exit
PB: predicated region body
PF: predicated region fallthrough
CT: control target
= control target key end

     0   :  { %s2239_s1 = inlined_call_operand.vmem [shape: f32[1024,128], index: 1, kind: input, shape index: {}]   ;;  %s2240_s0 = inlined_call_operand.vmem [shape: f32[8,1024], index: 0, kind: input, shape index: {}]   ;;  %s2241_s3 = inlined_call_operand.vmem [shape: f32[128,1024], index: 3, kind: input, shape index: {}]   ;;  %s2242_s2 = inlined_call_operand.vmem [shape: f32[1,128], index: 2, kind: input, shape index: {}]   ;;  %s2243_s4 = inlined_call_operand.vmem [shape: f32[1,1024], index: 4, kind: input, shape index: {}]   ;;  %s2244_s5 = inlined_call_operand.vmem [shape: f32[8,1024], index: 5, kind: output, shape index: {}]  }
   0x1   :  { %v44_v0 = vld [vmem:[%s2239_s1 + $0x80] sm:$0xff]  ;;  %v45_v1 = vld [vmem:[%s2239_s1 + $0x88] sm:$0xff]  ;;  %v46_v11 = vld [vmem:[%s2239_s1 + $0x90] sm:$0xff] }
   0x2   :  { %v28_v2 = vld [vmem:[%s2239_s1] sm:$0xff]  ;;  %v1091_v3 = vpack.c.bf16 %v45_v1, %v44_v0  ;;  %v29_v4 = vld [vmem:[%s2239_s1 + $0x8] sm:$0xff]  ;;  %v47_v13 = vld [vmem:[%s2239_s1 + $0x98] sm:$0xff] }
   0x3   :  { %v76_v5 = vld [vmem:[%s2239_s1 + $0x180] sm:$0xff]  ;;  %v77_v6 = vld [vmem:[%s2239_s1 + $0x188] sm:$0xff]  ;;  %v1093_v7 = vpack.c.bf16 %v29_v4, %v28_v2  ;;  %v30_v14 = vld [vmem:[%s2239_s1 + $0x10] sm:$0xff]  ;;  %v1095_v16 = vpack.c.bf16 %v47_v13, %v46_v11 }
   0x4   :  { %v1123_v8 = vpack.c.bf16 %v77_v6, %v76_v5  ;;  %v60_v9 = vld [vmem:[%s2239_s1 + $0x100] sm:$0xff]  ;;  %v61_v10 = vld [vmem:[%s2239_s1 + $0x108] sm:$0xff]  ;;  %1092 = vmatprep.subr.bf16.mxu0 %v1091_v3  ;;  %v31_v15 = vld [vmem:[%s2239_s1 + $0x18] sm:$0xff] }
   0x5   :  { %v1125_v12 = vpack.c.bf16 %v61_v10, %v60_v9  ;;  %1094 = vmatpush3.bf16.msra.mxu0 %v1093_v7  ;;  %v1097_v17 = vpack.c.bf16 %v31_v15, %v30_v14  ;;  %v78_v18 = vld [vmem:[%s2239_s1 + $0x190] sm:$0xff]  ;;  %v79_v19 = vld [vmem:[%s2239_s1 + $0x198] sm:$0xff]  ;;  %v48_v23 = vld [vmem:[%s2239_s1 + $0xa0] sm:$0xff] }
   0x6   :  { %1124 = vmatprep.subr.bf16.mxu1 %v1123_v8  ;;  %v62_v20 = vld [vmem:[%s2239_s1 + $0x110] sm:$0xff]  ;;  %v1127_v21 = vpack.c.bf16 %v79_v19, %v78_v18  ;;  %v63_v22 = vld [vmem:[%s2239_s1 + $0x118] sm:$0xff]  ;;  %v49_v24 = vld [vmem:[%s2239_s1 + $0xa8] sm:$0xff]  ;;  %1096 = vmatprep.subr.bf16.mxu0 %v1095_v16 }
   0x7   :  { %1126 = vmatpush3.bf16.msra.mxu1 %v1125_v12  ;;  %v1129_v25 = vpack.c.bf16 %v63_v22, %v62_v20  ;;  %v1099_v26 = vpack.c.bf16 %v49_v24, %v48_v23  ;;  %v32_v27 = vld [vmem:[%s2239_s1 + $0x20] sm:$0xff]  ;;  %v33_v28 = vld [vmem:[%s2239_s1 + $0x28] sm:$0xff]  ;;  %v50_v35 = vld [vmem:[%s2239_s1 + $0xb0] sm:$0xff] }
   0x8   :  { %v80_v29 = vld [vmem:[%s2239_s1 + $0x1a0] sm:$0xff]  ;;  %1128 = vmatprep.subr.bf16.mxu1 %v1127_v21  ;;  %v81_v30 = vld [vmem:[%s2239_s1 + $0x1a8] sm:$0xff]  ;;  %v1101_v33 = vpack.c.bf16 %v33_v28, %v32_v27  ;;  %v51_v36 = vld [vmem:[%s2239_s1 + $0xb8] sm:$0xff] }
   0x9   :  { %v64_v31 = vld [vmem:[%s2239_s1 + $0x120] sm:$0xff]  ;;  %v65_v32 = vld [vmem:[%s2239_s1 + $0x128] sm:$0xff]  ;;  %1098 = vmatpush3.bf16.msra.mxu0 %v1097_v17  ;;  %v1131_v34 = vpack.c.bf16 %v81_v30, %v80_v29  ;;  %v34_v37 = vld [vmem:[%s2239_s1 + $0x30] sm:$0xff]  ;;  %v1103_v39 = vpack.c.bf16 %v51_v36, %v50_v35 }
   0xa   :  { %1100 = vmatprep.subr.bf16.mxu0 %v1099_v26  ;;  %v1133_v38 = vpack.c.bf16 %v65_v32, %v64_v31  ;;  %v35_v40 = vld [vmem:[%s2239_s1 + $0x38] sm:$0xff]  ;;  %v82_v41 = vld [vmem:[%s2239_s1 + $0x1b0] sm:$0xff]  ;;  %v52_v46 = vld [vmem:[%s2239_s1 + $0xc0] sm:$0xff] }
   0xb   :  { %1130 = vmatpush3.bf16.msra.mxu1 %v1129_v25  ;;  %v83_v42 = vld [vmem:[%s2239_s1 + $0x1b8] sm:$0xff]  ;;  %v66_v44 = vld [vmem:[%s2239_s1 + $0x130] sm:$0xff]  ;;  %v53_v47 = vld [vmem:[%s2239_s1 + $0xc8] sm:$0xff]  ;;  %v1105_v48 = vpack.c.bf16 %v35_v40, %v34_v37 }
   0xc   :  { %1132 = vmatprep.subr.bf16.mxu1 %v1131_v34  ;;  %v1135_v43 = vpack.c.bf16 %v83_v42, %v82_v41  ;;  %v67_v45 = vld [vmem:[%s2239_s1 + $0x138] sm:$0xff]  ;;  %v84_v49 = vld [vmem:[%s2239_s1 + $0x1c0] sm:$0xff]  ;;  %v85_v50 = vld [vmem:[%s2239_s1 + $0x1c8] sm:$0xff]  ;;  %v1107_v52 = vpack.c.bf16 %v53_v47, %v52_v46 }
   0xd   :  { %1102 = vmatpush3.bf16.msra.mxu0 %v1101_v33  ;;  %v1137_v51 = vpack.c.bf16 %v67_v45, %v66_v44  ;;  %v36_v53 = vld [vmem:[%s2239_s1 + $0x40] sm:$0xff]  ;;  %v37_v54 = vld [vmem:[%s2239_s1 + $0x48] sm:$0xff]  ;;  %v1139_v56 = vpack.c.bf16 %v85_v50, %v84_v49  ;;  %v54_v58 = vld [vmem:[%s2239_s1 + $0xd0] sm:$0xff] }
   0xe   :  { %1104 = vmatprep.subr.bf16.mxu0 %v1103_v39  ;;  %v68_v55 = vld [vmem:[%s2239_s1 + $0x140] sm:$0xff]  ;;  %v69_v57 = vld [vmem:[%s2239_s1 + $0x148] sm:$0xff]  ;;  %v55_v59 = vld [vmem:[%s2239_s1 + $0xd8] sm:$0xff]  ;;  %v1109_v62 = vpack.c.bf16 %v37_v54, %v36_v53 }
   0xf   :  { %1134 = vmatpush3.bf16.msra.mxu1 %v1133_v38  ;;  %v86_v60 = vld [vmem:[%s2239_s1 + $0x1d0] sm:$0xff]  ;;  %v87_v61 = vld [vmem:[%s2239_s1 + $0x1d8] sm:$0xff]  ;;  %v1141_v63 = vpack.c.bf16 %v69_v57, %v68_v55  ;;  %v1111_v0 = vpack.c.bf16 %v55_v59, %v54_v58  ;;  %v56_v6 = vld [vmem:[%s2239_s1 + $0xe0] sm:$0xff] }
  0x10   :  { %1136 = vmatprep.subr.bf16.mxu1 %v1135_v43  ;;  %v38_v1 = vld [vmem:[%s2239_s1 + $0x50] sm:$0xff]  ;;  %v39_v2 = vld [vmem:[%s2239_s1 + $0x58] sm:$0xff]  ;;  %v1143_v4 = vpack.c.bf16 %v87_v61, %v86_v60  ;;  %v57_v7 = vld [vmem:[%s2239_s1 + $0xe8] sm:$0xff] }
  0x11   :  { %1106 = vmatpush3.bf16.msra.mxu0 %v1105_v48  ;;  %v70_v3 = vld [vmem:[%s2239_s1 + $0x150] sm:$0xff]  ;;  %v71_v5 = vld [vmem:[%s2239_s1 + $0x158] sm:$0xff]  ;;  %v88_v8 = vld [vmem:[%s2239_s1 + $0x1e0] sm:$0xff]  ;;  %v1113_v10 = vpack.c.bf16 %v39_v2, %v38_v1  ;;  %v1115_v14 = vpack.c.bf16 %v57_v7, %v56_v6 }
  0x12   :  { %1108 = vmatprep.subr.bf16.mxu0 %v1107_v52  ;;  %v89_v9 = vld [vmem:[%s2239_s1 + $0x1e8] sm:$0xff]  ;;  %v40_v11 = vld [vmem:[%s2239_s1 + $0x60] sm:$0xff]  ;;  %v1145_v13 = vpack.c.bf16 %v71_v5, %v70_v3  ;;  %v58_v19 = vld [vmem:[%s2239_s1 + $0xf0] sm:$0xff] }
  0x13   :  { %1138 = vmatpush3.bf16.msra.mxu1 %v1137_v51  ;;  %v41_v12 = vld [vmem:[%s2239_s1 + $0x68] sm:$0xff]  ;;  %v72_v15 = vld [vmem:[%s2239_s1 + $0x160] sm:$0xff]  ;;  %v1147_v18 = vpack.c.bf16 %v89_v9, %v88_v8  ;;  %v59_v20 = vld [vmem:[%s2239_s1 + $0xf8] sm:$0xff] }
  0x14   :  { %1140 = vmatprep.subr.bf16.mxu1 %v1139_v56  ;;  %v73_v16 = vld [vmem:[%s2239_s1 + $0x168] sm:$0xff]  ;;  %v23_v21 = vld [vmem:[%s2240_s0 + $0x18] sm:$0xff]  ;;  %v90_v22 = vld [vmem:[%s2239_s1 + $0x1f0] sm:$0xff]  ;;  %v1117_v24 = vpack.c.bf16 %v41_v12, %v40_v11  ;;  %v1119_v26 = vpack.c.bf16 %v59_v20, %v58_v19 }
  0x15   :  { %1110 = vmatpush3.bf16.msra.mxu0 %v1109_v62  ;;  %v21_v17 = vld [vmem:[%s2240_s0 + $0x8] sm:$0xff]  ;;  %v91_v23 = vld [vmem:[%s2239_s1 + $0x1f8] sm:$0xff]  ;;  %297 = vmatprep.mubr.f32.mxu1 %v23_v21  ;;  %v1149_v25 = vpack.c.bf16 %v73_v16, %v72_v15  ;;  %v42_v27 = vld [vmem:[%s2239_s1 + $0x70] sm:$0xff] }
  0x16   :  { %1112 = vmatprep.subr.bf16.mxu0 %v1111_v0  ;;  %227 = vmatprep.mubr.f32.mxu0 %v21_v17  ;;  %v43_v28 = vld [vmem:[%s2239_s1 + $0x78] sm:$0xff]  ;;  %v74_v29 = vld [vmem:[%s2239_s1 + $0x170] sm:$0xff]  ;;  %v1151_v30 = vpack.c.bf16 %v91_v23, %v90_v22  ;;  %v108_v32 = vld [vmem:[%s2239_s1 + $0x280] sm:$0xff] }
  0x17   :  { %1142 = vmatpush3.bf16.msra.mxu1 %v1141_v63  ;;  %v75_v31 = vld [vmem:[%s2239_s1 + $0x178] sm:$0xff]  ;;  %v109_v33 = vld [vmem:[%s2239_s1 + $0x288] sm:$0xff]  ;;  %v140_v34 = vld [vmem:[%s2239_s1 + $0x380] sm:$0xff]  ;;  %v1121_v36 = vpack.c.bf16 %v43_v28, %v42_v27 }
  0x18   :  { %1144 = vmatprep.subr.bf16.mxu1 %v1143_v4  ;;  %v141_v35 = vld [vmem:[%s2239_s1 + $0x388] sm:$0xff]  ;;  %v1153_v37 = vpack.c.bf16 %v75_v31, %v74_v29  ;;  %v1155_v38 = vpack.c.bf16 %v109_v33, %v108_v32  ;;  %v92_v39 = vld [vmem:[%s2239_s1 + $0x200] sm:$0xff]  ;;  %v110_v44 = vld [vmem:[%s2239_s1 + $0x290] sm:$0xff] }
  0x19   :  { %1114 = vmatpush3.bf16.msra.mxu0 %v1113_v10  ;;  %v93_v40 = vld [vmem:[%s2239_s1 + $0x208] sm:$0xff]  ;;  %v124_v41 = vld [vmem:[%s2239_s1 + $0x300] sm:$0xff]  ;;  %v1187_v42 = vpack.c.bf16 %v141_v35, %v140_v34  ;;  %v111_v45 = vld [vmem:[%s2239_s1 + $0x298] sm:$0xff] }
  0x1a   :  { %1116 = vmatprep.subr.bf16.mxu0 %v1115_v14  ;;  %v125_v43 = vld [vmem:[%s2239_s1 + $0x308] sm:$0xff]  ;;  %v142_v46 = vld [vmem:[%s2239_s1 + $0x390] sm:$0xff]  ;;  %v143_v47 = vld [vmem:[%s2239_s1 + $0x398] sm:$0xff]  ;;  %v1157_v49 = vpack.c.bf16 %v93_v40, %v92_v39  ;;  %v1159_v52 = vpack.c.bf16 %v111_v45, %v110_v44 }
  0x1b   :  { %1146 = vmatpush3.bf16.msra.mxu1 %v1145_v13  ;;  %v20_v48 = vld [vmem:[%s2240_s0] sm:$0xff]  ;;  %v22_v50 = vld [vmem:[%s2240_s0 + $0x10] sm:$0xff]  ;;  %v1189_v51 = vpack.c.bf16 %v125_v43, %v124_v41  ;;  %v95_v54 = vld [vmem:[%s2239_s1 + $0x218] sm:$0xff]  ;;  %v1191_v56 = vpack.c.bf16 %v143_v47, %v142_v46 }
  0x1c   :  { %1148 = vmatprep.subr.bf16.mxu1 %v1147_v18  ;;  %v94_v53 = vld [vmem:[%s2239_s1 + $0x210] sm:$0xff]  ;;  %v127_v57 = vld [vmem:[%s2239_s1 + $0x318] sm:$0xff]  ;;  %v112_v58 = vld [vmem:[%s2239_s1 + $0x2a0] sm:$0xff] }
  0x1d   :  { %1118 = vmatpush3.bf16.msra.mxu0 %v1117_v24  ;;  %v126_v55 = vld [vmem:[%s2239_s1 + $0x310] sm:$0xff]  ;;  %v113_v59 = vld [vmem:[%s2239_s1 + $0x2a8] sm:$0xff]  ;;  %v144_v60 = vld [vmem:[%s2239_s1 + $0x3a0] sm:$0xff]  ;;  %v1161_v62 = vpack.c.bf16 %v95_v54, %v94_v53 }
  0x1e   :  { %1120 = vmatprep.subr.bf16.mxu0 %v1119_v26  ;;  %v145_v61 = vld [vmem:[%s2239_s1 + $0x3a8] sm:$0xff]  ;;  %v1193_v63 = vpack.c.bf16 %v127_v57, %v126_v55  ;;  %v1163_v0 = vpack.c.bf16 %v113_v59, %v112_v58  ;;  %v96_v1 = vld [vmem:[%s2239_s1 + $0x220] sm:$0xff]  ;;  %v114_v6 = vld [vmem:[%s2239_s1 + $0x2b0] sm:$0xff] }
  0x1f   :  { %1150 = vmatpush3.bf16.msra.mxu1 %v1149_v25  ;;  %v97_v2 = vld [vmem:[%s2239_s1 + $0x228] sm:$0xff]  ;;  %v128_v3 = vld [vmem:[%s2239_s1 + $0x320] sm:$0xff]  ;;  %v1195_v4 = vpack.c.bf16 %v145_v61, %v144_v60  ;;  %v115_v7 = vld [vmem:[%s2239_s1 + $0x2b8] sm:$0xff] }
  0x20   :  { %1152 = vmatprep.subr.bf16.mxu1 %v1151_v30  ;;  %v129_v5 = vld [vmem:[%s2239_s1 + $0x328] sm:$0xff]  ;;  %v146_v8 = vld [vmem:[%s2239_s1 + $0x3b0] sm:$0xff]  ;;  %v147_v9 = vld [vmem:[%s2239_s1 + $0x3b8] sm:$0xff]  ;;  %v1165_v10 = vpack.c.bf16 %v97_v2, %v96_v1  ;;  %v1167_v12 = vpack.c.bf16 %v115_v7, %v114_v6 }
  0x21   :  { %1122 = vmatpush3.bf16.msra.mxu0 %v1121_v36  ;;  %v1197_v11 = vpack.c.bf16 %v129_v5, %v128_v3  ;;  %v98_v13 = vld [vmem:[%s2239_s1 + $0x230] sm:$0xff]  ;;  %v99_v14 = vld [vmem:[%s2239_s1 + $0x238] sm:$0xff]  ;;  %v1199_v16 = vpack.c.bf16 %v147_v9, %v146_v8  ;;  %v116_v18 = vld [vmem:[%s2239_s1 + $0x2c0] sm:$0xff] }
  0x22   :  { %1156 = vmatprep.subr.bf16.mxu0 %v1155_v38  ;;  %v130_v15 = vld [vmem:[%s2239_s1 + $0x330] sm:$0xff]  ;;  %v131_v17 = vld [vmem:[%s2239_s1 + $0x338] sm:$0xff]  ;;  %v117_v19 = vld [vmem:[%s2239_s1 + $0x2c8] sm:$0xff]  ;;  %v1169_v22 = vpack.c.bf16 %v99_v14, %v98_v13 }
  0x23   :  { %1154 = vmatpush3.bf16.msra.mxu1 %v1153_v37  ;;  %v148_v20 = vld [vmem:[%s2239_s1 + $0x3c0] sm:$0xff]  ;;  %v149_v21 = vld [vmem:[%s2239_s1 + $0x3c8] sm:$0xff]  ;;  %v27_v24 = vld [vmem:[%s2240_s0 + $0x38] sm:$0xff]  ;;  %v1201_v25 = vpack.c.bf16 %v131_v17, %v130_v15  ;;  %v1171_v26 = vpack.c.bf16 %v117_v19, %v116_v18 }
  0x24   :  { %1188 = vmatprep.subr.bf16.mxu1 %v1187_v42  ;;  %228 = vmatmul.mubr.f32.vlgmr.msra.gmra.mrb[0].mxu0 %v20_v48  ;;  %v25_v23 = vld [vmem:[%s2240_s0 + $0x28] sm:$0xff]  ;;  %v100_v27 = vld [vmem:[%s2239_s1 + $0x240] sm:$0xff]  ;;  %v1203_v30 = vpack.c.bf16 %v149_v21, %v148_v20  ;;  %v118_v32 = vld [vmem:[%s2239_s1 + $0x2d0] sm:$0xff] }
  0x25   :  { %1158 = vmatpush3.bf16.msra.mxu0 %v1157_v49  ;;  %v101_v28 = vld [vmem:[%s2239_s1 + $0x248] sm:$0xff]  ;;  %v132_v29 = vld [vmem:[%s2239_s1 + $0x340] sm:$0xff]  ;;  %v119_v33 = vld [vmem:[%s2239_s1 + $0x2d8] sm:$0xff]  ;;  %367 = vmatprep.mubr.f32.mxu0 %v25_v23 }
  0x26   :  { %298 = vmatmul.mubr.f32.vlgmr.msra.gmra.mrb[0].mxu1 %v22_v50  ;;  %1160 = vmatprep.subr.bf16.mxu0 %v1159_v52  ;;  %v133_v31 = vld [vmem:[%s2239_s1 + $0x348] sm:$0xff]  ;;  %v150_v34 = vld [vmem:[%s2239_s1 + $0x3d0] sm:$0xff]  ;;  %v151_v35 = vld [vmem:[%s2239_s1 + $0x3d8] sm:$0xff]  ;;  %v1173_v36 = vpack.c.bf16 %v101_v28, %v100_v27  ;;  %v1175_v38 = vpack.c.bf16 %v119_v33, %v118_v32 }
  0x27   :  { %1190 = vmatpush3.bf16.msra.mxu1 %v1189_v51  ;;  %437 = vmatprep.mubr.f32.mxu1 %v27_v24  ;;  %v1205_v37 = vpack.c.bf16 %v133_v31, %v132_v29  ;;  %v102_v39 = vld [vmem:[%s2239_s1 + $0x250] sm:$0xff]  ;;  %v103_v40 = vld [vmem:[%s2239_s1 + $0x258] sm:$0xff]  ;;  %v1207_v42 = vpack.c.bf16 %v151_v35, %v150_v34  ;;  %v120_v44 = vld [vmem:[%s2239_s1 + $0x2e0] sm:$0xff] }
  0x28   :  { %1192 = vmatprep.subr.bf16.mxu1 %v1191_v56  ;;  %v134_v41 = vld [vmem:[%s2239_s1 + $0x350] sm:$0xff]  ;;  %v135_v43 = vld [vmem:[%s2239_s1 + $0x358] sm:$0xff]  ;;  %v121_v45 = vld [vmem:[%s2239_s1 + $0x2e8] sm:$0xff]  ;;  %v1177_v48 = vpack.c.bf16 %v103_v40, %v102_v39 }
  0x29   :  { %1162 = vmatpush3.bf16.msra.mxu0 %v1161_v62  ;;  %v152_v46 = vld [vmem:[%s2239_s1 + $0x3e0] sm:$0xff]  ;;  %v153_v47 = vld [vmem:[%s2239_s1 + $0x3e8] sm:$0xff]  ;;  %v1209_v49 = vpack.c.bf16 %v135_v43, %v134_v41  ;;  %v1179_v50 = vpack.c.bf16 %v121_v45, %v120_v44  ;;  %v122_v56 = vld [vmem:[%s2239_s1 + $0x2f0] sm:$0xff] }
  0x2a   :  { %1164 = vmatprep.subr.bf16.mxu0 %v1163_v0  ;;  %v104_v51 = vld [vmem:[%s2239_s1 + $0x260] sm:$0xff]  ;;  %v105_v52 = vld [vmem:[%s2239_s1 + $0x268] sm:$0xff]  ;;  %v1211_v54 = vpack.c.bf16 %v153_v47, %v152_v46  ;;  %v123_v57 = vld [vmem:[%s2239_s1 + $0x2f8] sm:$0xff] }
  0x2b   :  { %1194 = vmatpush3.bf16.msra.mxu1 %v1193_v63  ;;  %v136_v53 = vld [vmem:[%s2239_s1 + $0x360] sm:$0xff]  ;;  %v137_v55 = vld [vmem:[%s2239_s1 + $0x368] sm:$0xff]  ;;  %v154_v58 = vld [vmem:[%s2239_s1 + $0x3f0] sm:$0xff]  ;;  %v1181_v60 = vpack.c.bf16 %v105_v52, %v104_v51  ;;  %v1183_v62 = vpack.c.bf16 %v123_v57, %v122_v56 }
  0x2c   :  { %1196 = vmatprep.subr.bf16.mxu1 %v1195_v4  ;;  %v155_v59 = vld [vmem:[%s2239_s1 + $0x3f8] sm:$0xff]  ;;  %v1213_v61 = vpack.c.bf16 %v137_v55, %v136_v53  ;;  %v106_v63 = vld [vmem:[%s2239_s1 + $0x270] sm:$0xff]  ;;  %v24_v6 = vld [vmem:[%s2240_s0 + $0x20] sm:$0xff] }
  0x2d   :  { %1166 = vmatpush3.bf16.msra.mxu0 %v1165_v10  ;;  %v107_v0 = vld [vmem:[%s2239_s1 + $0x278] sm:$0xff]  ;;  %v1215_v1 = vpack.c.bf16 %v155_v59, %v154_v58  ;;  %v138_v2 = vld [vmem:[%s2239_s1 + $0x370] sm:$0xff]  ;;  %v445_v8 = vld [vmem:[%s2241_s3 + $0x8] sm:$0xff] }
  0x2e   :  { %1168 = vmatprep.subr.bf16.mxu0 %v1167_v12  ;;  %v139_v3 = vld [vmem:[%s2239_s1 + $0x378] sm:$0xff]  ;;  %v1185_v4 = vpack.c.bf16 %v107_v0, %v106_v63  ;;  %v26_v7 = vld [vmem:[%s2240_s0 + $0x30] sm:$0xff]  ;;  %v453_v9 = vld [vmem:[%s2241_s3 + $0x48] sm:$0xff] }
  0x2f   :  { %1198 = vmatpush3.bf16.msra.mxu1 %v1197_v11  ;;  %v1217_v5 = vpack.c.bf16 %v139_v3, %v138_v2  ;;  %v447_v10 = vld [vmem:[%s2241_s3 + $0x18] sm:$0xff]  ;;  %v1219_v11 = vpack.c.bf16 %v453_v9, %v445_v8  ;;  %v444_v13 = vld [vmem:[%s2241_s3] sm:$0xff]  ;;  %v446_v17 = vld [vmem:[%s2241_s3 + $0x10] sm:$0xff] }
  0x30   :  { %1200 = vmatprep.subr.bf16.mxu1 %v1199_v16  ;;  %v455_v12 = vld [vmem:[%s2241_s3 + $0x58] sm:$0xff]  ;;  %v452_v14 = vld [vmem:[%s2241_s3 + $0x40] sm:$0xff]  ;;  %v454_v18 = vld [vmem:[%s2241_s3 + $0x50] sm:$0xff] }
  0x31   :  { %1170 = vmatpush3.bf16.msra.mxu0 %v1169_v22  ;;  %v1251_v15 = vpack.c.bf16 %v455_v12, %v447_v10  ;;  %v1221_v16 = vpack.c.bf16 %v452_v14, %v444_v13  ;;  %v461_v19 = vld [vmem:[%s2241_s3 + $0x88] sm:$0xff]  ;;  %v1253_v20 = vpack.c.bf16 %v454_v18, %v446_v17  ;;  %v463_v22 = vld [vmem:[%s2241_s3 + $0x98] sm:$0xff]  ;;  %v468_v27 = vld [vmem:[%s2241_s3 + $0xc0] sm:$0xff] }
  0x32   :  { %1172 = vmatprep.subr.bf16.mxu0 %v1171_v26  ;;  %v469_v21 = vld [vmem:[%s2241_s3 + $0xc8] sm:$0xff]  ;;  %v471_v23 = vld [vmem:[%s2241_s3 + $0xd8] sm:$0xff]  ;;  %v460_v26 = vld [vmem:[%s2241_s3 + $0x80] sm:$0xff] }
  0x33   :  { %1202 = vmatpush3.bf16.msra.mxu1 %v1201_v25  ;;  %v1223_v24 = vpack.c.bf16 %v469_v21, %v461_v19  ;;  %v1255_v25 = vpack.c.bf16 %v471_v23, %v463_v22  ;;  %v462_v28 = vld [vmem:[%s2241_s3 + $0x90] sm:$0xff]  ;;  %v1225_v29 = vpack.c.bf16 %v468_v27, %v460_v26  ;;  %v477_v31 = vld [vmem:[%s2241_s3 + $0x108] sm:$0xff]  ;;  %v479_v35 = vld [vmem:[%s2241_s3 + $0x118] sm:$0xff] }
  0x34   :  { %1204 = vmatprep.subr.bf16.mxu1 %v1203_v30  ;;  %v470_v30 = vld [vmem:[%s2241_s3 + $0xd0] sm:$0xff]  ;;  %v485_v32 = vld [vmem:[%s2241_s3 + $0x148] sm:$0xff]  ;;  %v484_v39 = vld [vmem:[%s2241_s3 + $0x140] sm:$0xff] }
  0x35   :  { %1174 = vmatpush3.bf16.msra.mxu0 %v1173_v36  ;;  %v1257_v33 = vpack.c.bf16 %v470_v30, %v462_v28  ;;  %v1227_v34 = vpack.c.bf16 %v485_v32, %v477_v31  ;;  %v487_v36 = vld [vmem:[%s2241_s3 + $0x158] sm:$0xff]  ;;  %v478_v40 = vld [vmem:[%s2241_s3 + $0x110] sm:$0xff]  ;;  %v493_v43 = vld [vmem:[%s2241_s3 + $0x188] sm:$0xff] }
  0x36   :  { %1176 = vmatprep.subr.bf16.mxu0 %v1175_v38  ;;  %v1259_v38 = vpack.c.bf16 %v487_v36, %v479_v35  ;;  %v486_v41 = vld [vmem:[%s2241_s3 + $0x150] sm:$0xff]  ;;  %v501_v44 = vld [vmem:[%s2241_s3 + $0x1c8] sm:$0xff]  ;;  %v495_v45 = vld [vmem:[%s2241_s3 + $0x198] sm:$0xff] }
  0x37   :  { %1206 = vmatpush3.bf16.msra.mxu1 %v1205_v37  ;;  %v476_v37 = vld [vmem:[%s2241_s3 + $0x100] sm:$0xff]  ;;  %v1261_v46 = vpack.c.bf16 %v486_v41, %v478_v40  ;;  %v1231_v47 = vpack.c.bf16 %v501_v44, %v493_v43  ;;  %v494_v52 = vld [vmem:[%s2241_s3 + $0x190] sm:$0xff]  ;;  %v517_v55 = vld [vmem:[%s2241_s3 + $0x248] sm:$0xff] }
  0x38   :  { %1208 = vmatprep.subr.bf16.mxu1 %v1207_v42  ;;  %v1229_v42 = vpack.c.bf16 %v484_v39, %v476_v37  ;;  %v502_v53 = vld [vmem:[%s2241_s3 + $0x1d0] sm:$0xff]  ;;  %v511_v56 = vld [vmem:[%s2241_s3 + $0x218] sm:$0xff]  ;;  %v525_v2 = vld [vmem:[%s2241_s3 + $0x288] sm:$0xff] }
  0x39   :  { %1178 = vmatpush3.bf16.msra.mxu0 %v1177_v48  ;;  %v503_v48 = vld [vmem:[%s2241_s3 + $0x1d8] sm:$0xff]  ;;  %v1265_v59 = vpack.c.bf16 %v502_v53, %v494_v52  ;;  %v510_v63 = vld [vmem:[%s2241_s3 + $0x210] sm:$0xff]  ;;  %v533_v3 = vld [vmem:[%s2241_s3 + $0x2c8] sm:$0xff] }
  0x3a   :  { %1180 = vmatprep.subr.bf16.mxu0 %v1179_v50  ;;  %v500_v50 = vld [vmem:[%s2241_s3 + $0x1c0] sm:$0xff]  ;;  %v1263_v51 = vpack.c.bf16 %v503_v48, %v495_v45  ;;  %v519_v57 = vld [vmem:[%s2241_s3 + $0x258] sm:$0xff]  ;;  %v1239_v8 = vpack.c.bf16 %v533_v3, %v525_v2  ;;  %v526_v12 = vld [vmem:[%s2241_s3 + $0x290] sm:$0xff] }
  0x3b   :  { %1210 = vmatpush3.bf16.msra.mxu1 %v1209_v49  ;;  %v492_v49 = vld [vmem:[%s2241_s3 + $0x180] sm:$0xff]  ;;  %v1267_v0 = vpack.c.bf16 %v519_v57, %v511_v56  ;;  %v534_v13 = vld [vmem:[%s2241_s3 + $0x2d0] sm:$0xff]  ;;  %v549_v17 = vld [vmem:[%s2241_s3 + $0x348] sm:$0xff] }
  0x3c   :  { %1212 = vmatprep.subr.bf16.mxu1 %v1211_v54  ;;  %v509_v54 = vld [vmem:[%s2241_s3 + $0x208] sm:$0xff]  ;;  %v1233_v58 = vpack.c.bf16 %v500_v50, %v492_v49  ;;  %v524_v9 = vld [vmem:[%s2241_s3 + $0x280] sm:$0xff]  ;;  %v543_v18 = vld [vmem:[%s2241_s3 + $0x318] sm:$0xff] }
  0x3d   :  { %1182 = vmatpush3.bf16.msra.mxu0 %v1181_v60  ;;  %v1235_v60 = vpack.c.bf16 %v517_v55, %v509_v54  ;;  %v532_v10 = vld [vmem:[%s2241_s3 + $0x2c0] sm:$0xff]  ;;  %v550_v26 = vld [vmem:[%s2241_s3 + $0x350] sm:$0xff]  ;;  %v557_v28 = vld [vmem:[%s2241_s3 + $0x388] sm:$0xff] }
  0x3e   :  { %1184 = vmatprep.subr.bf16.mxu0 %v1183_v62  ;;  %v516_v62 = vld [vmem:[%s2241_s3 + $0x240] sm:$0xff]  ;;  %v1241_v14 = vpack.c.bf16 %v532_v10, %v524_v9  ;;  %v559_v30 = vld [vmem:[%s2241_s3 + $0x398] sm:$0xff]  ;;  %v558_v37 = vld [vmem:[%s2241_s3 + $0x390] sm:$0xff] }
  0x3f   :  { %1214 = vmatpush3.bf16.msra.mxu1 %v1213_v61  ;;  %v508_v61 = vld [vmem:[%s2241_s3 + $0x200] sm:$0xff]  ;;  %v567_v32 = vld [vmem:[%s2241_s3 + $0x3d8] sm:$0xff]  ;;  %v449_v40 = vld [vmem:[%s2241_s3 + $0x28] sm:$0xff] }
  0x40   :  { %1216 = vmatprep.subr.bf16.mxu1 %v1215_v1  ;;  %v518_v1 = vld [vmem:[%s2241_s3 + $0x250] sm:$0xff]  ;;  %v540_v21 = vld [vmem:[%s2241_s3 + $0x300] sm:$0xff]  ;;  %v1279_v35 = vpack.c.bf16 %v567_v32, %v559_v30  ;;  %v457_v41 = vld [vmem:[%s2241_s3 + $0x68] sm:$0xff] }
  0x41   :  { %1186 = vmatpush3.bf16.msra.mxu0 %v1185_v4  ;;  %v527_v4 = vld [vmem:[%s2241_s3 + $0x298] sm:$0xff]  ;;  %v548_v22 = vld [vmem:[%s2241_s3 + $0x340] sm:$0xff]  ;;  %v1283_v43 = vpack.c.bf16 %v457_v41, %v449_v40  ;;  %v458_v2 = vld [vmem:[%s2241_s3 + $0x70] sm:$0xff] }
  0x42   :  { %1220 = vmatprep.subr.bf16.mxu0 %v1219_v11  ;;  %v459_v44 = vld [vmem:[%s2241_s3 + $0x78] sm:$0xff]  ;;  %v950_v48 = vld [vmem:[%s2242_s2] ss:$0 sm:$0xff]  ;;  %v465_v3 = vld [vmem:[%s2241_s3 + $0xa8] sm:$0xff] }
  0x43   :  { %1218 = vmatpush3.bf16.msra.mxu1 %v1217_v5  ;;  %v535_v5 = vld [vmem:[%s2241_s3 + $0x2d8] sm:$0xff]  ;;  %v464_v10 = vld [vmem:[%s2241_s3 + $0xa0] sm:$0xff]  ;;  %v505_v30 = vld [vmem:[%s2241_s3 + $0x1e8] sm:$0xff] }
  0x44   :  { %368 = vmatmul.mubr.f32.vlgmr.msra.gmra.mrb[2].mxu0 %v24_v6  ;;  %1252 = vmatprep.subr.bf16.mxu1 %v1251_v15  ;;  %v1237_v6 = vpack.c.bf16 %v516_v62, %v508_v61  ;;  %v1271_v11 = vpack.c.bf16 %v535_v5, %v527_v4  ;;  %v1273_v15 = vpack.c.bf16 %v534_v13, %v526_v12  ;;  %v448_v62 = vld [vmem:[%s2241_s3 + $0x20] sm:$0xff]  ;;  %v473_v4 = vld [vmem:[%s2241_s3 + $0xe8] sm:$0xff]  ;;  %v467_v5 = vld [vmem:[%s2241_s3 + $0xb8] sm:$0xff] }
  0x45   :  { %1222 = vmatpush1.bf16.msra.mxu0 %v1221_v16  ;;  %v541_v16 = vld [vmem:[%s2241_s3 + $0x308] sm:$0xff]  ;;  %v1287_v13 = vpack.c.bf16 %v473_v4, %v465_v3  ;;  %v507_v32 = vld [vmem:[%s2241_s3 + $0x1f8] sm:$0xff]  ;;  %v506_v40 = vld [vmem:[%s2241_s3 + $0x1f0] sm:$0xff] }
  0x46   :  { %438 = vmatmul.mubr.f32.vlgmr.msra.gmra.mrb[2].mxu1 %v26_v7  ;;  %1224 = vmatprep.subr.bf16.mxu0 %v1223_v24  ;;  %v1269_v7 = vpack.c.bf16 %v518_v1, %v510_v63  ;;  %v1243_v19 = vpack.c.bf16 %v549_v17, %v541_v16  ;;  %v1245_v24 = vpack.c.bf16 %v548_v22, %v540_v21  ;;  %v456_v63 = vld [vmem:[%s2241_s3 + $0x60] sm:$0xff]  ;;  %v450_v1 = vld [vmem:[%s2241_s3 + $0x30] sm:$0xff]  ;;  %v481_v17 = vld [vmem:[%s2241_s3 + $0x128] sm:$0xff] }
  0x47   :  { %1254 = vmatpush1.bf16.msra.mxu1 %v1253_v20  ;;  %v551_v20 = vld [vmem:[%s2241_s3 + $0x358] sm:$0xff]  ;;  %v1317_v9 = vpack.c.bf16 %v458_v2, %v450_v1  ;;  %v474_v16 = vld [vmem:[%s2241_s3 + $0xf0] sm:$0xff]  ;;  %v513_v41 = vld [vmem:[%s2241_s3 + $0x228] sm:$0xff] }
  0x48   :  { %1256 = vmatprep.subr.bf16.mxu1 %v1255_v25  ;;  %v1275_v23 = vpack.c.bf16 %v551_v20, %v543_v18  ;;  %v542_v25 = vld [vmem:[%s2241_s3 + $0x310] sm:$0xff]  ;;  %v489_v18 = vld [vmem:[%s2241_s3 + $0x168] sm:$0xff]  ;;  %v491_v20 = vld [vmem:[%s2241_s3 + $0x178] sm:$0xff] }
  0x49   :  { %1226 = vmatpush1.bf16.msra.mxu0 %v1225_v29  ;;  %v1277_v27 = vpack.c.bf16 %v550_v26, %v542_v25  ;;  %v565_v29 = vld [vmem:[%s2241_s3 + $0x3c8] sm:$0xff]  ;;  %v1291_v25 = vpack.c.bf16 %v489_v18, %v481_v17  ;;  %v547_v3 = vld [vmem:[%s2241_s3 + $0x338] sm:$0xff] }
  0x4a   :  { %1228 = vmatprep.subr.bf16.mxu0 %v1227_v34  ;;  %v1247_v31 = vpack.c.bf16 %v565_v29, %v557_v28  ;;  %v564_v34 = vld [vmem:[%s2241_s3 + $0x3c0] sm:$0xff]  ;;  %v490_v28 = vld [vmem:[%s2241_s3 + $0x170] sm:$0xff]  ;;  %v497_v29 = vld [vmem:[%s2241_s3 + $0x1a8] sm:$0xff] }
  0x4b   :  { %1258 = vmatpush1.bf16.msra.mxu1 %v1257_v33  ;;  %v556_v33 = vld [vmem:[%s2241_s3 + $0x380] sm:$0xff]  ;;  %v545_v1 = vld [vmem:[%s2241_s3 + $0x328] sm:$0xff]  ;;  %v555_v4 = vld [vmem:[%s2241_s3 + $0x378] sm:$0xff] }
  0x4c   :  { %1260 = vmatprep.subr.bf16.mxu1 %v1259_v38  ;;  %v1249_v36 = vpack.c.bf16 %v564_v34, %v556_v33  ;;  %v566_v38 = vld [vmem:[%s2241_s3 + $0x3d0] sm:$0xff]  ;;  %v553_v2 = vld [vmem:[%s2241_s3 + $0x368] sm:$0xff]  ;;  %v571_v17 = vld [vmem:[%s2241_s3 + $0x3f8] sm:$0xff] }
  0x4d   :  { %1230 = vmatpush1.bf16.msra.mxu0 %v1229_v42  ;;  %v1281_v39 = vpack.c.bf16 %v566_v38, %v558_v37  ;;  %v451_v42 = vld [vmem:[%s2241_s3 + $0x38] sm:$0xff]  ;;  %v1295_v37 = vpack.c.bf16 %v505_v30, %v497_v29 }
  0x4e   :  { %1232 = vmatprep.subr.bf16.mxu0 %v1231_v47  ;;  %v1315_v45 = vpack.c.bf16 %v459_v44, %v451_v42  ;;  %v521_v42 = vld [vmem:[%s2241_s3 + $0x268] sm:$0xff]  ;;  %v523_v44 = vld [vmem:[%s2241_s3 + $0x278] sm:$0xff] }
  0x4f   :  { %1262 = vmatpush1.bf16.msra.mxu1 %v1261_v46  ;;  %v1380_v46 = vmov 0.0  }
  0x50   :  { %1264 = vmatprep.subr.bf16.mxu1 %v1263_v51  ;;  %678 = vmatprep.mubr.f32.mxu0 %v1380_v46 }
  0x51   :  { %1234 = vmatpush1.bf16.msra.mxu0 %v1233_v58  ;;  %749 = vmatprep.mubr.f32.mxu1 %v1380_v46 }
  0x52   :  { %1236 = vmatprep.subr.bf16.mxu0 %v1235_v60 }
  0x53   :  { %1266 = vmatpush1.bf16.msra.mxu1 %v1265_v59 }
  0x54   :  { %1268 = vmatprep.subr.bf16.mxu1 %v1267_v0 }
  0x55   :  { %1238 = vmatpush1.bf16.msra.mxu0 %v1237_v6  ;;  %v475_v6 = vld [vmem:[%s2241_s3 + $0xf8] sm:$0xff] }
  0x56   :  { %1240 = vmatprep.subr.bf16.mxu0 %v1239_v8  ;;  %v1285_v8 = vpack.c.bf16 %v456_v63, %v448_v62  ;;  %v530_v63 = vld [vmem:[%s2241_s3 + $0x2b0] sm:$0xff] }
  0x57   :  { %1270 = vmatpush1.bf16.msra.mxu1 %v1269_v7 }
  0x58   :  { %1272 = vmatprep.subr.bf16.mxu1 %v1271_v11  ;;  %v472_v11 = vld [vmem:[%s2241_s3 + $0xe0] sm:$0xff] }
  0x59   :  { %1242 = vmatpush1.bf16.msra.mxu0 %v1241_v14  ;;  %v1319_v14 = vpack.c.bf16 %v475_v6, %v467_v5  ;;  %v1289_v21 = vpack.c.bf16 %v472_v11, %v464_v10  ;;  %v1339_v10 = vpack.c.bf16 %v555_v4, %v547_v3  ;;  %v546_v11 = vld [vmem:[%s2241_s3 + $0x330] sm:$0xff] }
  0x5a   :  { %1244 = vmatprep.subr.bf16.mxu0 %v1243_v19  ;;  %v483_v19 = vld [vmem:[%s2241_s3 + $0x138] sm:$0xff] }
  0x5b   :  { %1274 = vmatpush1.bf16.msra.mxu1 %v1273_v15  ;;  %v466_v15 = vld [vmem:[%s2241_s3 + $0xb0] sm:$0xff]  ;;  %v1323_v26 = vpack.c.bf16 %v491_v20, %v483_v19  ;;  %v560_v20 = vld [vmem:[%s2241_s3 + $0x3a0] sm:$0xff] }
  0x5c   :  { %1276 = vmatprep.subr.bf16.mxu1 %v1275_v23  ;;  %v1321_v22 = vpack.c.bf16 %v474_v16, %v466_v15  ;;  %v480_v23 = vld [vmem:[%s2241_s3 + $0x120] sm:$0xff]  ;;  %v569_v15 = vld [vmem:[%s2241_s3 + $0x3e8] sm:$0xff]  ;;  %v563_v16 = vld [vmem:[%s2241_s3 + $0x3b8] sm:$0xff] }
  0x5d   :  { %1246 = vmatpush1.bf16.msra.mxu0 %v1245_v24  ;;  %v488_v24 = vld [vmem:[%s2241_s3 + $0x160] sm:$0xff] }
  0x5e   :  { %1248 = vmatprep.subr.bf16.mxu0 %v1247_v31  ;;  %v499_v31 = vld [vmem:[%s2241_s3 + $0x1b8] sm:$0xff]  ;;  %v1293_v33 = vpack.c.bf16 %v488_v24, %v480_v23  ;;  %v568_v23 = vld [vmem:[%s2241_s3 + $0x3e0] sm:$0xff]  ;;  %v562_v24 = vld [vmem:[%s2241_s3 + $0x3b0] sm:$0xff] }
  0x5f   :  { %1278 = vmatpush1.bf16.msra.mxu1 %v1277_v27  ;;  %v482_v27 = vld [vmem:[%s2241_s3 + $0x130] sm:$0xff]  ;;  %v1327_v38 = vpack.c.bf16 %v507_v32, %v499_v31  ;;  %v572_v32 = vld [vmem:[%s2243_s4] sm:$0xff] }
  0x60   :  { %1280 = vmatprep.subr.bf16.mxu1 %v1279_v35  ;;  %v1325_v34 = vpack.c.bf16 %v490_v28, %v482_v27  ;;  %v496_v35 = vld [vmem:[%s2241_s3 + $0x1a0] sm:$0xff]  ;;  %v574_v28 = vlaneseq }
  0x61   :  { %1250 = vmatpush1.bf16.msra.mxu0 %v1249_v36  ;;  %v504_v36 = vld [vmem:[%s2241_s3 + $0x1e0] sm:$0xff] }
  0x62   :  { %1284 = vmatprep.subr.bf16.mxu0 %v1283_v43  ;;  %v515_v43 = vld [vmem:[%s2241_s3 + $0x238] sm:$0xff]  ;;  %v575_v29 = vshrl.u32 %v574_v28, 7 }
  0x63   :  { %1282 = vmatpush1.bf16.msra.mxu1 %v1281_v39  ;;  %v498_v39 = vld [vmem:[%s2241_s3 + $0x1b0] sm:$0xff] }
  0x64   :  { %1316 = vmatprep.subr.bf16.mxu1 %v1315_v45  ;;  %v1297_v45 = vpack.c.bf16 %v504_v36, %v496_v35  ;;  %v576_v30 = vsub.s32 0, %v575_v29  ;;  %v584_v31 = vsub.s32 2, %v575_v29 }
  0x66   :  { %v577_v35 = vrot.slane %v572_v32, %v576_v30  ;;  %v585_v36 = vrot.slane %v572_v32, %v584_v31 }
  0xf7   :  { %v983_v47 = vpop.f32.mrb[0].mxu0 }
  0xf8   :  { %v984_v49 = vpop.f32.mrb[1].mxu0 }
  0xf9   :  { %v1018_v50 = vpop.f32.mrb[0].mxu1  ;;  %v985_v51 = vadd.f32 %v984_v49, %v983_v47  ;;  %v512_v47 = vld [vmem:[%s2241_s3 + $0x220] sm:$0xff]  ;;  %v1299_v49 = vpack.c.bf16 %v521_v42, %v513_v41 }
  0xfa   :  { %v1019_v52 = vpop.f32.mrb[1].mxu1 }
  0xfb   :  { %v1020_v53 = vadd.f32 %v1019_v52, %v1018_v50  ;;  %v230_v54 = vadd.f32 %v985_v51, %v950_v48  ;;  %v520_v48 = vld [vmem:[%s2241_s3 + $0x260] sm:$0xff]  ;;  %v1331_v50 = vpack.c.bf16 %v523_v44, %v515_v43  ;;  %v514_v51 = vld [vmem:[%s2241_s3 + $0x230] sm:$0xff] }
  0xfc   :  { %v522_v52 = vld [vmem:[%s2241_s3 + $0x270] sm:$0xff] }
  0xfd   :  { %v300_v55 = vadd.f32 %v1020_v53, %v230_v54  ;;  %v529_v53 = vld [vmem:[%s2241_s3 + $0x2a8] sm:$0xff] }
  0xfe   :  { %v537_v54 = vld [vmem:[%s2241_s3 + $0x2e8] sm:$0xff] }
 0x117   :  { %v1053_v56 = vpop.f32.mrb[2].mxu0 }
 0x118   :  { %v1054_v57 = vpop.f32.mrb[3].mxu0 }
 0x119   :  { %v1088_v58 = vpop.f32.mrb[2].mxu1  ;;  %v1055_v59 = vadd.f32 %v1054_v57, %v1053_v56  ;;  %v539_v56 = vld [vmem:[%s2241_s3 + $0x2f8] sm:$0xff]  ;;  %v1301_v57 = vpack.c.bf16 %v520_v48, %v512_v47 }
 0x11a   :  { %v1089_v60 = vpop.f32.mrb[3].mxu1 }
 0x11b   :  { %v1090_v61 = vadd.f32 %v1089_v60, %v1088_v58  ;;  %v370_v0 = vadd.f32 %v1055_v59, %v300_v55  ;;  %v531_v55 = vld [vmem:[%s2241_s3 + $0x2b8] sm:$0xff]  ;;  %v1333_v58 = vpack.c.bf16 %v522_v52, %v514_v51  ;;  %v528_v59 = vld [vmem:[%s2241_s3 + $0x2a0] sm:$0xff] }
 0x11c   :  { %v536_v60 = vld [vmem:[%s2241_s3 + $0x2e0] sm:$0xff]  ;;  %v1335_v62 = vpack.c.bf16 %v539_v56, %v531_v55 }
 0x11d   :  { %v440_v7 = vadd.f32 %v1090_v61, %v370_v0  ;;  %v1303_v61 = vpack.c.bf16 %v537_v54, %v529_v53  ;;  %v538_v0 = vld [vmem:[%s2241_s3 + $0x2f0] sm:$0xff]  ;;  %v1305_v5 = vpack.c.bf16 %v536_v60, %v528_v59 }
 0x11e   :  { %v1337_v6 = vpack.c.bf16 %v538_v0, %v530_v63  ;;  %v600_v63 = vsub.s32 6, %v575_v29  ;;  %v596_v0 = vsub.s32 5, %v575_v29 }
 0x11f   :  { %v2056_v12 = vmax.f32 %v440_v7, 0.0  ;;  %v544_v7 = vld [vmem:[%s2241_s3 + $0x320] sm:$0xff] }
 0x120   :  { %v601_v3 = vrot.slane %v572_v32, %v600_v63 }
 0x121   :  { %679 = vmatmul.mubr.f32.vlgmr.msra.gmra.mrb[4].mxu0 %v2056_v12  ;;  %750 = vmatmul.mubr.f32.vlgmr.msra.gmra.mrb[4].mxu1 %v2056_v12 }
 0x122   :  { %1286 = vmatpush1.bf16.msra.mxu0 %v1285_v8  ;;  %1318 = vmatpush1.bf16.msra.mxu1 %v1317_v9  ;;  %v552_v8 = vld [vmem:[%s2241_s3 + $0x360] sm:$0xff]  ;;  %v1307_v9 = vpack.c.bf16 %v553_v2, %v545_v1  ;;  %v604_v1 = vsub.s32 7, %v575_v29 }
 0x123   :  { %1288 = vmatprep.subr.bf16.mxu0 %v1287_v13  ;;  %1320 = vmatprep.subr.bf16.mxu1 %v1319_v14  ;;  %v554_v13 = vld [vmem:[%s2241_s3 + $0x370] sm:$0xff]  ;;  %v561_v14 = vld [vmem:[%s2241_s3 + $0x3a8] sm:$0xff]  ;;  %v1309_v18 = vpack.c.bf16 %v552_v8, %v544_v7 }
 0x124   :  { %820 = vmatprep.mubr.f32.mxu0 %v1380_v46  ;;  %891 = vmatprep.mubr.f32.mxu1 %v1380_v46  ;;  %v1329_v46 = vpack.c.bf16 %v506_v40, %v498_v39  ;;  %v1341_v19 = vpack.c.bf16 %v554_v13, %v546_v11 }
 0x126   :  { %1290 = vmatpush1.bf16.msra.mxu0 %v1289_v21  ;;  %1322 = vmatpush1.bf16.msra.mxu1 %v1321_v22  ;;  %v1311_v21 = vpack.c.bf16 %v569_v15, %v561_v14  ;;  %v1343_v22 = vpack.c.bf16 %v571_v17, %v563_v16 }
 0x127   :  { %1292 = vmatprep.subr.bf16.mxu0 %v1291_v25  ;;  %1324 = vmatprep.subr.bf16.mxu1 %v1323_v26  ;;  %v570_v25 = vld [vmem:[%s2241_s3 + $0x3f0] sm:$0xff]  ;;  %v1313_v26 = vpack.c.bf16 %v568_v23, %v560_v20 }
 0x128   :  { %v1345_v27 = vpack.c.bf16 %v570_v25, %v562_v24 }
 0x12a   :  { %1294 = vmatpush1.bf16.msra.mxu0 %v1293_v33  ;;  %1326 = vmatpush1.bf16.msra.mxu1 %v1325_v34  ;;  %v580_v33 = vsub.s32 1, %v575_v29  ;;  %v588_v34 = vsub.s32 3, %v575_v29 }
 0x12b   :  { %1296 = vmatprep.subr.bf16.mxu0 %v1295_v37  ;;  %1328 = vmatprep.subr.bf16.mxu1 %v1327_v38 }
 0x12c   :  { %v581_v37 = vrot.slane %v572_v32, %v580_v33  ;;  %v589_v38 = vrot.slane %v572_v32, %v588_v34 }
 0x12e   :  { %1298 = vmatpush1.bf16.msra.mxu0 %v1297_v45  ;;  %1330 = vmatpush1.bf16.msra.mxu1 %v1329_v46 }
 0x12f   :  { %1300 = vmatprep.subr.bf16.mxu0 %v1299_v49  ;;  %1332 = vmatprep.subr.bf16.mxu1 %v1331_v50 }
 0x132   :  { %1302 = vmatpush1.bf16.msra.mxu0 %v1301_v57  ;;  %1334 = vmatpush1.bf16.msra.mxu1 %v1333_v58 }
 0x133   :  { %1304 = vmatprep.subr.bf16.mxu0 %v1303_v61  ;;  %1336 = vmatprep.subr.bf16.mxu1 %v1335_v62  ;;  %v592_v62 = vsub.s32 4, %v575_v29 }
 0x135   :  { %v593_v2 = vrot.slane %v572_v32, %v592_v62 }
 0x136   :  { %1306 = vmatpush1.bf16.msra.mxu0 %v1305_v5  ;;  %1338 = vmatpush1.bf16.msra.mxu1 %v1337_v6  ;;  %v597_v5 = vrot.slane %v572_v32, %v596_v0  ;;  %v605_v6 = vrot.slane %v572_v32, %v604_v1 }
 0x137   :  { %1308 = vmatprep.subr.bf16.mxu0 %v1307_v9  ;;  %1340 = vmatprep.subr.bf16.mxu1 %v1339_v10 }
 0x13a   :  { %1310 = vmatpush1.bf16.msra.mxu0 %v1309_v18  ;;  %1342 = vmatpush1.bf16.msra.mxu1 %v1341_v19 }
 0x13b   :  { %1312 = vmatprep.subr.bf16.mxu0 %v1311_v21  ;;  %1344 = vmatprep.subr.bf16.mxu1 %v1343_v22 }
 0x13e   :  { %1314 = vmatpush1.bf16.msra.mxu0 %v1313_v26  ;;  %1346 = vmatpush1.bf16.msra.mxu1 %v1345_v27 }
 0x141   :  { %821 = vmatmul.mubr.f32.vlgmr.msra.gmra.mrb[6].mxu0 %v2056_v12  ;;  %892 = vmatmul.mubr.f32.vlgmr.msra.gmra.mrb[6].mxu1 %v2056_v12 }
 0x1f4   :  { %v680_v39 = vpop.f32.mrb[4].mxu0  ;;  %v751_v40 = vpop.f32.mrb[4].mxu1 }
 0x1f5   :  { %v681_v41 = vadd.f32 %v680_v39, %v577_v35  ;;  %v752_v42 = vadd.f32 %v751_v40, %v585_v36  ;;  %v682_v43 = vpop.f32.mrb[5].mxu0  ;;  %v753_v12 = vpop.f32.mrb[5].mxu1 }
 0x1f6   :  { %v683_v44 = vadd.f32 %v682_v43, %v581_v37  ;;  %v754_v45 = vadd.f32 %v753_v12, %v589_v38 }
 0x1f7   :  { %v898_v46 = vsub.f32 0.0, %v681_v41  ;;  %v900_v47 = vsub.f32 0.0, %v752_v42 }
 0x1f8   :  { %v899_v48 = vsub.f32 0.0, %v683_v44  ;;  %v901_v49 = vsub.f32 0.0, %v754_v45 }
 0x1f9   :  { %v906_v50 = vmul.f32 1.442695, %v898_v46  ;;  %v910_v51 = vmul.f32 1.442695, %v900_v47 }
 0x1fa   :  { %v908_v52 = vmul.f32 1.442695, %v899_v48  ;;  %v912_v53 = vmul.f32 1.442695, %v901_v49 }
 0x1fb   :  { %1348 = vpow2.f32 %v906_v50 }
 0x1fc   :  { %1350 = vpow2.f32 %v910_v51 }
 0x1fd   :  { %1352 = vpow2.f32 %v908_v52 }
 0x1fe   :  { %1354 = vpow2.f32 %v912_v53 }
 0x205   :  { %v1349_v54 = vpop.eup %1348 }
 0x206   :  { %v1351_v55 = vpop.eup %1350  ;;  %v922_v56 = vadd.f32 1.0, %v1349_v54 }
 0x207   :  { %v1353_v57 = vpop.eup %1352  ;;  %v924_v58 = vadd.f32 1.0, %v1351_v55 }
 0x208   :  { %v1355_v59 = vpop.eup %1354  ;;  %1356 = vrcp.f32 %v922_v56  ;;  %v923_v60 = vadd.f32 1.0, %v1353_v57 }
 0x209   :  { %1358 = vrcp.f32 %v924_v58  ;;  %v925_v61 = vadd.f32 1.0, %v1355_v59 }
 0x20a   :  { %1360 = vrcp.f32 %v923_v60 }
 0x20b   :  { %1362 = vrcp.f32 %v925_v61 }
 0x212   :  { %v1357_v4 = vpop.eup %1356 }
 0x213   :  { %v1359_v7 = vpop.eup %1358  ;;  %938 = vst [vmem:[%s2244_s5] sm:$0xff] %v1357_v4 }
 0x214   :  { %v1361_v8 = vpop.eup %1360  ;;  %940 = vst [vmem:[%s2244_s5 + $0x10] sm:$0xff] %v1359_v7  ;;  %v822_v9 = vpop.f32.mrb[6].mxu0 }
 0x215   :  { %v893_v10 = vpop.f32.mrb[6].mxu1  ;;  %v1363_v11 = vpop.eup %1362  ;;  %939 = vst [vmem:[%s2244_s5 + $0x8] sm:$0xff] %v1361_v8  ;;  %v823_v13 = vadd.f32 %v822_v9, %v593_v2 }
 0x216   :  { %v894_v14 = vadd.f32 %v893_v10, %v601_v3  ;;  %v824_v15 = vpop.f32.mrb[7].mxu0  ;;  %v895_v16 = vpop.f32.mrb[7].mxu1  ;;  %941 = vst [vmem:[%s2244_s5 + $0x18] sm:$0xff] %v1363_v11 }
 0x217   :  { %v825_v17 = vadd.f32 %v824_v15, %v597_v5  ;;  %v896_v18 = vadd.f32 %v895_v16, %v605_v6  ;;  %v902_v19 = vsub.f32 0.0, %v823_v13 }
 0x218   :  { %v904_v20 = vsub.f32 0.0, %v894_v14 }
 0x219   :  { %v903_v21 = vsub.f32 0.0, %v825_v17  ;;  %v905_v22 = vsub.f32 0.0, %v896_v18  ;;  %v914_v23 = vmul.f32 1.442695, %v902_v19 }
 0x21a   :  { %v918_v24 = vmul.f32 1.442695, %v904_v20 }
 0x21b   :  { %v916_v25 = vmul.f32 1.442695, %v903_v21  ;;  %v920_v26 = vmul.f32 1.442695, %v905_v22  ;;  %1364 = vpow2.f32 %v914_v23 }
 0x21c   :  { %1366 = vpow2.f32 %v918_v24 }
 0x21d   :  { %1368 = vpow2.f32 %v916_v25 }
 0x21e   :  { %1370 = vpow2.f32 %v920_v26 }
 0x225   :  { %v1365_v27 = vpop.eup %1364 }
 0x226   :  { %v1367_v28 = vpop.eup %1366  ;;  %v926_v29 = vadd.f32 1.0, %v1365_v27 }
 0x227   :  { %v1369_v30 = vpop.eup %1368  ;;  %v928_v31 = vadd.f32 1.0, %v1367_v28 }
 0x228   :  { %v1371_v32 = vpop.eup %1370  ;;  %1372 = vrcp.f32 %v926_v29  ;;  %v927_v33 = vadd.f32 1.0, %v1369_v30 }
 0x229   :  { %1374 = vrcp.f32 %v928_v31  ;;  %v929_v34 = vadd.f32 1.0, %v1371_v32 }
 0x22a   :  { %1376 = vrcp.f32 %v927_v33 }
 0x22b   :  { %1378 = vrcp.f32 %v929_v34 }
 0x232   :  { %v1373_v35 = vpop.eup %1372 }
 0x233   :  { %v1375_v36 = vpop.eup %1374  ;;  %942 = vst [vmem:[%s2244_s5 + $0x20] sm:$0xff] %v1373_v35 }
 0x234   :  { %v1377_v37 = vpop.eup %1376  ;;  %944 = vst [vmem:[%s2244_s5 + $0x30] sm:$0xff] %v1375_v36 }
 0x235   :  { %v1379_v38 = vpop.eup %1378  ;;  %943 = vst [vmem:[%s2244_s5 + $0x28] sm:$0xff] %v1377_v37 }
 0x236   :  { %945 = vst [vmem:[%s2244_s5 + $0x38] sm:$0xff] %v1379_v38 }

</bundles_post_ra>
